<compile_context>
chip_gen: v5e
topology: v5e:2x2
jax: 0.10.0
libtpu: 0.0.40
codegen_flags: <defaults>
</compile_context>

<pallas_src>
import jax
import jax.numpy as jnp
import numpy as np
from jax.experimental import pallas as pl
from jax.experimental.pallas import tpu as pltpu

ZOOM = 1000 * 0.2  # = 200.0

_INPUT_BLOCK_BUDGET = 6 * 1024 * 1024   # target bytes of x per grid block
_VMEM_LIMIT_BYTES = 48 * 1024 * 1024    # 2x buffered blocks + temps, < v7x 64 MiB


def projector_kernel(basis_ref, x_ref, o_ref):
    # basis_ref: (9,)        f32 in SMEM; rows 1-2 already pre-scaled by ZOOM.
    # x_ref:     (3, N, TB)  transport dtype in VMEM -- coord, point, batch-on-lanes.
    # o_ref:     (4, TB)     f32 in VMEM -- rows [min y0, min y1, max y0, max y1].
    x0 = x_ref[0].astype(jnp.float32)  # (N, TB)
    x1 = x_ref[1].astype(jnp.float32)
    x2 = x_ref[2].astype(jnp.float32)

    # Homogeneous coordinate + cheap EUP reciprocal (ZOOM is folded into the
    # projected basis rows, so s is simply 1/w).
    # TODO(synk): torch raises ValueError when the homogeneous coordinate is 0;
    # there is no in-kernel exception mechanism, so a zero silently yields
    # inf/nan here instead.
    w = basis_ref[0] * x0 + basis_ref[1] * x1 + basis_ref[2] * x2
    s = pl.reciprocal(w, approx=True)

    # 3x3 projection as scalar-broadcast FMAs on the VPU (a K=3 contraction on
    # the MXU would be <3% utilized; this kernel is HBM-bandwidth bound).
    # Reductions are interleaved so y0 is dead before y1 exists (fewer live
    # block-sized VMEM temporaries -> allows the larger batch tile).
    y0 = (basis_ref[3] * x0 + basis_ref[4] * x1 + basis_ref[5] * x2) * s
    o_ref[0:1, :] = jnp.min(y0, axis=0, keepdims=True)
    o_ref[2:3, :] = jnp.max(y0, axis=0, keepdims=True)

    y1 = (basis_ref[6] * x0 + basis_ref[7] * x1 + basis_ref[8] * x2) * s
    o_ref[1:2, :] = jnp.min(y1, axis=0, keepdims=True)
    o_ref[3:4, :] = jnp.max(y1, axis=0, keepdims=True)


def _round_up(v, m):
    return (v + m - 1) // m * m


def _choose_batch_tile(B, N, block_b):
    """Batch (lane) tile: as big as the VMEM budget allows, a multiple of 128,
    capped at roundup(ceil(B/2), 128) so a v7x megacore sees >= 2 grid steps."""
    if B <= 128:
        return B                                   # single full-extent block
    cap = max(128, (_INPUT_BLOCK_BUDGET // (3 * N * 4)) // 128 * 128)
    if block_b is not None:                        # user override, floored to 128
        cap = min(cap, max(128, (block_b // 128) * 128))
    half = _round_up(-(-B // 2), 128)              # roundup(ceil(B/2), 128)
    return min(cap, half)


def projector_nn(x, basis, block_b=None, transport_dtype=jnp.float32):
    """x: (B, N, 3), basis: (3, 3) -> (B, 2, 2) float32 bounding boxes."""
    B, N, C = x.shape
    assert C == 3 and basis.shape == (3, 3)

    transport_dtype = jnp.dtype(transport_dtype)
    tb = _choose_batch_tile(B, N, block_b)
    grid = (pl.cdiv(B, tb),)   # boundary block is clipped by Pallas; no padding pass

    # Lane-dense layout: batch on the 128-wide lane axis (one XLA pass; ideally
    # the producer would emit (3, N, B) directly and this vanishes).
    xt = jnp.transpose(x, (2, 1, 0)).astype(transport_dtype)   # (3, N, B)

    # Fold zoom into the two projected rows: y = (zoom*basis[1:]) @ x / (basis[0] @ x).
    basis_scaled = jnp.asarray(basis, jnp.float32) * jnp.array(
        [[1.0], [ZOOM], [ZOOM]], dtype=jnp.float32)
    basis_flat = basis_scaled.reshape(9)

    cost = pl.CostEstimate(
        flops=int(17 * B * N),                     # 9 mul + 6 add + 2 scale per point
        transcendentals=int(B * N),                # one reciprocal per point
        bytes_accessed=int(3 * N * B * transport_dtype.itemsize + 4 * B * 4 + 36),
    )

    out4 = pl.pallas_call(
        projector_kernel,
        out_shape=jax.ShapeDtypeStruct((4, B), jnp.float32),
        grid_spec=pltpu.PrefetchScalarGridSpec(
            num_scalar_prefetch=0,
            grid=grid,
            in_specs=[
                pl.BlockSpec(memory_space=pltpu.MemorySpace.SMEM),   # 9 basis scalars
                pl.BlockSpec((3, N, tb), lambda i: (0, 0, i)),       # lane-dense points
            ],
            out_specs=pl.BlockSpec((4, tb), lambda i: (0, i)),
        ),
        compiler_params=pltpu.CompilerParams(
            dimension_semantics=("parallel",),     # batch tiles shard across v7x TCs
            vmem_limit_bytes=_VMEM_LIMIT_BYTES,
        ),
        cost_estimate=cost,
    )(basis_flat, xt)

    # rows [min y0, min y1, max y0, max y1] -> (B, 2, 2) with row0 = min, row1 = max
    return jnp.transpose(out4.reshape(2, 2, B), (2, 0, 1))


def projector_ref(x, basis):
    """Pure-numpy (float64) reference of the torch forward."""
    x64 = np.asarray(x, dtype=np.float64)
    b64 = np.asarray(basis, dtype=np.float64)
    xb = x64 @ b64.T                                  # (..., N, 3)
    y = xb / xb[..., 0:1] * ZOOM                      # (..., N, 3)
    y = y[..., 1:]                                    # (..., N, 2)
    return np.stack([y.min(axis=-2), y.max(axis=-2)], axis=-2)   # (..., 2, 2)


if __name__ == "__main__":
    key = jax.random.PRNGKey(0)
    k_basis, k_x, k_x2 = jax.random.split(key, 3)

    # --- check 1: small shapes, single full-extent block -------------------
    basis = jax.random.normal(k_basis, (3, 3), dtype=jnp.float32)
    B, N = 2, 8
    x = jax.random.normal(k_x, (B, N, 3), dtype=jnp.float32)

    out = jax.block_until_ready(projector_nn(x, basis))
    ref = projector_ref(np.asarray(x), np.asarray(basis))
    assert out.shape == (B, 2, 2)
    assert np.allclose(np.asarray(out), ref, rtol=3e-2, atol=2e-2)

    # --- check 2a: multi-block grid (3 steps) + clipped boundary block -----
    B2, N2 = 300, 16
    basis2 = jnp.array([[1.0, 0.5, 0.25],
                        [0.3, -1.2, 0.8],
                        [-0.7, 0.4, 1.5]], dtype=jnp.float32)
    x2 = jax.random.uniform(k_x2, (B2, N2, 3), dtype=jnp.float32,
                            minval=0.5, maxval=1.5)
    ref2 = projector_ref(np.asarray(x2), np.asarray(basis2))

    out2a = jax.block_until_ready(projector_nn(x2, basis2, block_b=128))
    assert out2a.shape == (B2, 2, 2)
    assert np.allclose(np.asarray(out2a), ref2, rtol=5e-3, atol=2e-3)

    # --- check 2b: auto tile (>=2 grid steps for megacore) + clipped block --
    out2b = jax.block_until_ready(projector_nn(x2, basis2))
    assert out2b.shape == (B2, 2, 2)
    assert np.allclose(np.asarray(out2b), ref2, rtol=5e-3, atol=2e-3)

    # --- check 3: optional bf16 transport (halves HBM traffic); loose bound --
    out3 = jax.block_until_ready(
        projector_nn(x2, basis2, transport_dtype=jnp.bfloat16))
    assert out3.shape == (B2, 2, 2)
    assert np.all(np.isfinite(np.asarray(out3)))
    assert np.allclose(np.asarray(out3), ref2, rtol=1e-1, atol=2.0)

    print("KERNEL_OK")
</pallas_src>

<mosaic_0001>
module attributes {stable_mosaic.version = 11 : i64} {
  func.func @projector_kernel(%arg0: i32, %arg1: memref<9xf32, #tpu.memory_space<smem>>, %arg2: memref<3x8x2xf32, #tpu.memory_space<vmem>>, %arg3: memref<4x2xf32, #tpu.memory_space<vmem>>) attributes {dimension_semantics = [#tpu.dimension_semantics<parallel>], iteration_bounds = array<i64: 1>, scalar_prefetch = 0 : i64, scratch_operands = 0 : i64, tpu.core_type = #tpu.core_type<tc>, window_params = [{transform_indices = @transform_0, window_bounds = array<i64: 9>}, {transform_indices = @transform_1, window_bounds = array<i64: 3, 8, 2>}, {transform_indices = @transform_2, window_bounds = array<i64: 4, 2>}]} {
    %c0 = arith.constant 0 : index
    %c0_0 = arith.constant 0 : index
    %c0_1 = arith.constant 0 : index
    %0 = vector.load %arg2[%c0, %c0_0, %c0_1] : memref<3x8x2xf32, #tpu.memory_space<vmem>>, vector<1x8x2xf32>
    %1 = vector.shape_cast %0 : vector<1x8x2xf32> to vector<8x2xf32>
    %c1 = arith.constant 1 : index
    %c0_2 = arith.constant 0 : index
    %c0_3 = arith.constant 0 : index
    %2 = vector.load %arg2[%c1, %c0_2, %c0_3] : memref<3x8x2xf32, #tpu.memory_space<vmem>>, vector<1x8x2xf32>
    %3 = vector.shape_cast %2 : vector<1x8x2xf32> to vector<8x2xf32>
    %c2 = arith.constant 2 : index
    %c0_4 = arith.constant 0 : index
    %c0_5 = arith.constant 0 : index
    %4 = vector.load %arg2[%c2, %c0_4, %c0_5] : memref<3x8x2xf32, #tpu.memory_space<vmem>>, vector<1x8x2xf32>
    %5 = vector.shape_cast %4 : vector<1x8x2xf32> to vector<8x2xf32>
    %c0_6 = arith.constant 0 : index
    %6 = memref.load %arg1[%c0_6] : memref<9xf32, #tpu.memory_space<smem>>
    %7 = vector.broadcast %6 : f32 to vector<8x2xf32>
    %8 = arith.mulf %7, %1 : vector<8x2xf32>
    %c1_7 = arith.constant 1 : index
    %9 = memref.load %arg1[%c1_7] : memref<9xf32, #tpu.memory_space<smem>>
    %10 = vector.broadcast %9 : f32 to vector<8x2xf32>
    %11 = arith.mulf %10, %3 : vector<8x2xf32>
    %12 = arith.addf %8, %11 : vector<8x2xf32>
    %c2_8 = arith.constant 2 : index
    %13 = memref.load %arg1[%c2_8] : memref<9xf32, #tpu.memory_space<smem>>
    %14 = vector.broadcast %13 : f32 to vector<8x2xf32>
    %15 = arith.mulf %14, %5 : vector<8x2xf32>
    %16 = arith.addf %12, %15 : vector<8x2xf32>
    %17 = tpu.reciprocal %16 {approx = true} : vector<8x2xf32> -> vector<8x2xf32>
    %c3 = arith.constant 3 : index
    %18 = memref.load %arg1[%c3] : memref<9xf32, #tpu.memory_space<smem>>
    %19 = vector.broadcast %18 : f32 to vector<8x2xf32>
    %20 = arith.mulf %19, %1 : vector<8x2xf32>
    %c4 = arith.constant 4 : index
    %21 = memref.load %arg1[%c4] : memref<9xf32, #tpu.memory_space<smem>>
    %22 = vector.broadcast %21 : f32 to vector<8x2xf32>
    %23 = arith.mulf %22, %3 : vector<8x2xf32>
    %24 = arith.addf %20, %23 : vector<8x2xf32>
    %c5 = arith.constant 5 : index
    %25 = memref.load %arg1[%c5] : memref<9xf32, #tpu.memory_space<smem>>
    %26 = vector.broadcast %25 : f32 to vector<8x2xf32>
    %27 = arith.mulf %26, %5 : vector<8x2xf32>
    %28 = arith.addf %24, %27 : vector<8x2xf32>
    %29 = arith.mulf %28, %17 : vector<8x2xf32>
    %cst = arith.constant dense<0x7F800000> : vector<2xf32>
    %30 = vector.multi_reduction <minimumf>, %29, %cst [0] : vector<8x2xf32> to vector<2xf32>
    %31 = vector.shape_cast %30 : vector<2xf32> to vector<1x2xf32>
    %c0_9 = arith.constant 0 : index
    %c0_10 = arith.constant 0 : index
    %32 = vector.load %arg3[%c0_9, %c0_10] : memref<4x2xf32, #tpu.memory_space<vmem>>, vector<1x2xf32>
    tpu.vector_store %arg3[%c0_9, %c0_10], %31 {strides = array<i32>} : memref<4x2xf32, #tpu.memory_space<vmem>>, vector<1x2xf32>,
    %cst_11 = arith.constant dense<0xFF800000> : vector<2xf32>
    %33 = vector.multi_reduction <maximumf>, %29, %cst_11 [0] : vector<8x2xf32> to vector<2xf32>
    %34 = vector.shape_cast %33 : vector<2xf32> to vector<1x2xf32>
    %c2_12 = arith.constant 2 : index
    %c0_13 = arith.constant 0 : index
    %35 = vector.load %arg3[%c2_12, %c0_13] : memref<4x2xf32, #tpu.memory_space<vmem>>, vector<1x2xf32>
    tpu.vector_store %arg3[%c2_12, %c0_13], %34 {strides = array<i32>} : memref<4x2xf32, #tpu.memory_space<vmem>>, vector<1x2xf32>,
    %c6 = arith.constant 6 : index
    %36 = memref.load %arg1[%c6] : memref<9xf32, #tpu.memory_space<smem>>
    %37 = vector.broadcast %36 : f32 to vector<8x2xf32>
    %38 = arith.mulf %37, %1 : vector<8x2xf32>
    %c7 = arith.constant 7 : index
    %39 = memref.load %arg1[%c7] : memref<9xf32, #tpu.memory_space<smem>>
    %40 = vector.broadcast %39 : f32 to vector<8x2xf32>
    %41 = arith.mulf %40, %3 : vector<8x2xf32>
    %42 = arith.addf %38, %41 : vector<8x2xf32>
    %c8 = arith.constant 8 : index
    %43 = memref.load %arg1[%c8] : memref<9xf32, #tpu.memory_space<smem>>
    %44 = vector.broadcast %43 : f32 to vector<8x2xf32>
    %45 = arith.mulf %44, %5 : vector<8x2xf32>
    %46 = arith.addf %42, %45 : vector<8x2xf32>
    %47 = arith.mulf %46, %17 : vector<8x2xf32>
    %cst_14 = arith.constant dense<0x7F800000> : vector<2xf32>
    %48 = vector.multi_reduction <minimumf>, %47, %cst_14 [0] : vector<8x2xf32> to vector<2xf32>
    %49 = vector.shape_cast %48 : vector<2xf32> to vector<1x2xf32>
    %c1_15 = arith.constant 1 : index
    %c0_16 = arith.constant 0 : index
    %50 = vector.load %arg3[%c1_15, %c0_16] : memref<4x2xf32, #tpu.memory_space<vmem>>, vector<1x2xf32>
    tpu.vector_store %arg3[%c1_15, %c0_16], %49 {strides = array<i32>} : memref<4x2xf32, #tpu.memory_space<vmem>>, vector<1x2xf32>,
    %cst_17 = arith.constant dense<0xFF800000> : vector<2xf32>
    %51 = vector.multi_reduction <maximumf>, %47, %cst_17 [0] : vector<8x2xf32> to vector<2xf32>
    %52 = vector.shape_cast %51 : vector<2xf32> to vector<1x2xf32>
    %c3_18 = arith.constant 3 : index
    %c0_19 = arith.constant 0 : index
    %53 = vector.load %arg3[%c3_18, %c0_19] : memref<4x2xf32, #tpu.memory_space<vmem>>, vector<1x2xf32>
    tpu.vector_store %arg3[%c3_18, %c0_19], %52 {strides = array<i32>} : memref<4x2xf32, #tpu.memory_space<vmem>>, vector<1x2xf32>,
    return
  }
  func.func @transform_0(%arg0: i32) -> i32 {
    %c0_i32 = arith.constant 0 : i32
    %c0_i32_0 = arith.constant 0 : i32
    return %c0_i32 : i32
  }
  func.func @transform_1(%arg0: i32) -> (i32, i32, i32) {
    %c0_i32 = arith.constant 0 : i32
    %c0_i32_0 = arith.constant 0 : i32
    %c0_i32_1 = arith.constant 0 : i32
    return %c0_i32, %c0_i32_0, %arg0 : i32, i32, i32
  }
  func.func @transform_2(%arg0: i32) -> (i32, i32) {
    %c0_i32 = arith.constant 0 : i32
    %c0_i32_0 = arith.constant 0 : i32
    return %c0_i32, %arg0 : i32, i32
  }
}

</mosaic_0001>

<bundles_post_ra>
// kernel: tpu_custom_call.1
= control target key start
LH: loop header
LB: loop body
LE: loop exit
PB: predicated region body
PF: predicated region fallthrough
CT: control target
= control target key end

     0   :  { %7 = vsyncpa [#allocation3], 0  ;;  %s131_s12 = smov [#allocation2]   ;;  %s171_s0 = inlined_call_operand.vmem [shape: f32[9], index: 0, kind: input, shape index: {}]   ;;  %s172_s1 = inlined_call_operand.vmem [shape: f32[3,8,2], index: 1, kind: input, shape index: {}]   ;;  %s173_s2 = inlined_call_operand.vmem [shape: f32[4,2], index: 2, kind: output, shape index: {}]  }
   0x1   :  { %s13_s11 = sshll.u32 %s171_s0, 4  ;;  %s14_s11 = int_to_ptr.vmem [resolvable:$true] %s13_s11 }
   0x2   :  { %16 = dma.vmem_to_smem %s14_s11, 16, %s131_s12, [#allocation3]  }
   0x3   :  { %129 = dma.done.wait [#allocation3], 16  }
   0x4   :  { %130 = vsyncadd [#allocation3], 4294967280 }
   0x5   :  { %23 = sfence }
   0x6   :  { %s29_s13 = sld [smem:[#allocation2]]  ;;  %v24_v0 = vld [vmem:[%s172_s1] sm:$0xff]  ;;  %v104_v1 = vld [vmem:[%s172_s1 + $0x8] sm:$0xff]  ;;  %v105_v2 = vld [vmem:[%s172_s1 + $0x10] sm:$0xff]  ;;  %vm53_vm0 = vcmask 15360   ;;  %vm61_vm1 = vcmask 8192  }
   0x7   :  { %s106_s14 = sld [smem:[#allocation2 + $0x1]] }
   0x8   :  { %s107_s15 = sld [smem:[#allocation2 + $0x2]] }
   0x9   :  { %s108_s16 = sld [smem:[#allocation2 + $0x3]] }
   0xa   :  { %s109_s19 = sld [smem:[#allocation2 + $0x4]] }
   0xb   :  { %s110_s0 = sld [smem:[#allocation2 + $0x5]] }
   0xc   :  { %v30_v3 = vstv %s29_s13  ;;  %s111_s24 = sld [smem:[#allocation2 + $0x6]] }
   0xd   :  { %v31_v4 = vmul.f32 %v30_v3, %v24_v0  ;;  %v33_v5 = vstv %s106_s14  ;;  %s112_s25 = sld [smem:[#allocation2 + $0x7]] }
   0xe   :  { %v34_v6 = vmul.f32 %v104_v1, %v33_v5  ;;  %v37_v7 = vstv %s107_s15  ;;  %s113_s26 = sld [smem:[#allocation2 + $0x8]] }
   0xf   :  { %v38_v8 = vmul.f32 %v105_v2, %v37_v7  ;;  %v42_v9 = vstv %s108_s16 }
  0x10   :  { %v35_v10 = vadd.f32 %v34_v6, %v31_v4  ;;  %v43_v11 = vmul.f32 %v42_v9, %v24_v0  ;;  %v45_v12 = vstv %s109_s19 }
  0x11   :  { %v46_v13 = vmul.f32 %v104_v1, %v45_v12  ;;  %v49_v14 = vstv %s110_s0 }
  0x12   :  { %v39_v15 = vadd.f32 %v38_v8, %v35_v10  ;;  %v72_v16 = vstv %s111_s24  ;;  %v50_v18 = vmul.f32 %v105_v2, %v49_v14 }
  0x13   :  { %v47_v17 = vadd.f32 %v46_v13, %v43_v11  ;;  %v73_v19 = vmul.f32 %v72_v16, %v24_v0  ;;  %v75_v20 = vstv %s112_s25 }
  0x14   :  { %115 = vrcp.f32 %v39_v15  ;;  %v76_v21 = vmul.f32 %v104_v1, %v75_v20  ;;  %v79_v22 = vstv %s113_s26 }
  0x15   :  { %v80_v23 = vmul.f32 %v105_v2, %v79_v22  ;;  %v51_v25 = vadd.f32 %v50_v18, %v47_v17 }
  0x16   :  { %v77_v24 = vadd.f32 %v76_v21, %v73_v19 }
  0x18   :  { %v81_v26 = vadd.f32 %v80_v23, %v77_v24 }
  0x1a   :  { %v116_v27 = vpop.eup %115 }
  0x1b   :  { %v52_v28 = vmul.f32 %v116_v27, %v51_v25  ;;  %v82_v29 = vmul.f32 %v116_v27, %v81_v26 }
  0x1d   :  { %v54_v30 = vsel %vm53_vm0, %v52_v28, inf  ;;  %v63_v31 = vsel %vm53_vm0, %v52_v28, -inf  ;;  %v83_v32 = vsel %vm53_vm0, %v82_v29, inf  ;;  %v91_v33 = vsel %vm53_vm0, %v82_v29, -inf }
  0x1e   :  { %v55_v34 = vrot.slane %v54_v30, 4  ;;  %v64_v35 = vrot.slane %v63_v31, 4  ;;  %v84_v36 = vrot.slane %v83_v32, 4  ;;  %v92_v37 = vrot.slane %v91_v33, 4 }
  0x20   :  { %v56_v38 = vmin.f32 %v54_v30, %v55_v34  ;;  %v65_v39 = vmax.f32 %v63_v31, %v64_v35  ;;  %v85_v40 = vmin.f32 %v83_v32, %v84_v36  ;;  %v93_v41 = vmax.f32 %v91_v33, %v92_v37 }
  0x22   :  { %v57_v42 = vrot.slane %v56_v38, 2  ;;  %v66_v43 = vrot.slane %v65_v39, 2  ;;  %v86_v44 = vrot.slane %v85_v40, 2  ;;  %v94_v45 = vrot.slane %v93_v41, 2 }
  0x24   :  { %v58_v46 = vmin.f32 %v56_v38, %v57_v42  ;;  %v67_v47 = vmax.f32 %v65_v39, %v66_v43  ;;  %v87_v48 = vmin.f32 %v85_v40, %v86_v44  ;;  %v95_v49 = vmax.f32 %v93_v41, %v94_v45 }
  0x26   :  { %v59_v50 = vrot.slane %v58_v46, 1  ;;  %v68_v51 = vrot.slane %v67_v47, 1  ;;  %v88_v52 = vrot.slane %v87_v48, 1  ;;  %v96_v53 = vrot.slane %v95_v49, 1 }
  0x28   :  { %v60_v54 = vmin.f32 %v58_v46, %v59_v50  ;;  %v69_v55 = vmax.f32 %v67_v47, %v68_v51  ;;  %v89_v56 = vmin.f32 %v87_v48, %v88_v52  ;;  %v97_v57 = vmax.f32 %v95_v49, %v96_v53 }
  0x2a   :  { %62 = vst.msk [vmem:[%s173_s2] sm:$0x1] %vm61_vm1, %v60_v54 }
  0x2b   :  { %70 = vst.msk [vmem:[%s173_s2 + $0x2] sm:$0x1] %vm61_vm1, %v69_v55 }
  0x2c   :  { %90 = vst.msk [vmem:[%s173_s2 + $0x1] sm:$0x1] %vm61_vm1, %v89_v56 }
  0x2d   :  { %98 = vst.msk [vmem:[%s173_s2 + $0x3] sm:$0x1] %vm61_vm1, %v97_v57 }
  0x2e   :  { %103 = vsyncpa [#allocation3], 1 }

</bundles_post_ra>
